<compile_context>
chip_gen: v7x
topology: tpu7x:2x2x1
jax: 0.10.0
libtpu: 0.0.40
codegen_flags: <defaults>
</compile_context>

<pallas_src>
import jax
import jax.numpy as jnp
from jax.experimental import pallas as pl
from jax.experimental.pallas import tpu as pltpu


# ----------------------------------------------------------------------------
# Kernel
# ----------------------------------------------------------------------------
def _encoder_kernel(z_ref, wd_ref, w1_ref, w2_ref, shift_ref, mask_ref,
                    out_ref, buf, slab):
    """All activations are channel-major (C on sublanes, fused positions on lanes).

    Lane layout (one grid step, Nb samples): sample b occupies the column
    segment [b*seg, (b+1)*seg) with seg = L_out + 4; its valid data sits at
    buffer positions [b*seg + 4, b*seg + 4 + L_out) and the 4 leading columns
    of each segment are zeros (they are simultaneously the right halo of
    sample b-1 and the left halo of sample b).

    z_ref   : (1, 2*C_in, W)   even/odd-deinterleaved, gapped input (cdtype)
    wd_ref  : (C_out, 6*C_in)  downsample taps stacked along K (6th block = 0)
    w1_ref  : (C_out, 5*C_out) conv1 taps * bn1 scale, stacked along K
    w2_ref  : (C_out, 5*C_out) conv2 taps * bn2 scale, stacked along K
    shift_ref: (C_out, 2)      folded BN shifts [bn1, bn2] (f32)
    mask_ref: (1, Wout)        1.0 on valid output columns, 0.0 on gap columns
    out_ref : (1, C_out, Wout) lane-dense gapped output slab
    buf     : (C_out, W)       persistent activation buffer, W = Wout + 4
    slab    : (K_max, Wout)    persistent im2col slab scratch
    """
    C_out, W = buf.shape
    Wout = slab.shape[1]              # = W - 4
    Cz = z_ref.shape[1]               # 2 * C_in (even/odd stacked channels)
    Kd = wd_ref.shape[1]              # 6 * C_in
    Kc = w1_ref.shape[1]              # 5 * C_out
    cdtype = buf.dtype

    @pl.when(pl.program_id(0) == 0)
    def _init():
        # The 4 outermost buffer columns never influence valid outputs (every
        # halo/gap column that matters is rebuilt by the masked select below);
        # zero them once so the discarded columns stay deterministic.
        buf[:, 0:2] = jnp.zeros((C_out, 2), cdtype)
        buf[:, W - 2:W] = jnp.zeros((C_out, 2), cdtype)

    # Hoisted once per grid step; full-shape compare avoids an i1 broadcast
    # and jnp.where keeps gap columns exactly zero even for garbage inputs.
    valid = jnp.broadcast_to(mask_ref[...], (C_out, Wout)) > 0.0

    shifts = shift_ref[...]           # (C_out, 2) f32
    b1 = shifts[:, 0:1]
    b2 = shifts[:, 1:2]

    # ---- downsample (k=5, stride=2, pad=2): ONE batch-fused MXU matmul -----
    # zin channels = [even(x_pad); odd(x_pad)]; 3 lane shifts cover the 5 taps
    # (the 6th weight block is zero).
    zin = z_ref[0]                                            # (2*C_in, W)
    for s in range(3):
        slab[s * Cz:(s + 1) * Cz, :] = zin[:, s:s + Wout]
    y = jnp.dot(wd_ref[...], slab[0:Kd, :],
                preferred_element_type=jnp.float32)           # (C_out, Wout)
    buf[:, 2:2 + Wout] = jnp.where(valid, y, 0.0).astype(cdtype)

    # ---- conv1 (k=5, pad=2) + bn1 + relu: ONE matmul (scale folded in w1) ---
    a = buf[...]                                              # (C_out, W)
    for k in range(5):
        slab[k * C_out:(k + 1) * C_out, :] = a[:, k:k + Wout]
    y = jnp.dot(w1_ref[...], slab[0:Kc, :],
                preferred_element_type=jnp.float32)
    y = jnp.maximum(y + b1, 0.0)                              # f32 epilogue
    buf[:, 2:2 + Wout] = jnp.where(valid, y, 0.0).astype(cdtype)

    # ---- conv2 (k=5, pad=2) + bn2 + relu -> lane-dense output slab ----------
    a = buf[...]
    for k in range(5):
        slab[k * C_out:(k + 1) * C_out, :] = a[:, k:k + Wout]
    y = jnp.dot(w2_ref[...], slab[0:Kc, :],
                preferred_element_type=jnp.float32)
    y = jnp.maximum(y + b2, 0.0)
    out_ref[0] = y.astype(out_ref.dtype)                      # gaps discarded by wrapper


# ----------------------------------------------------------------------------
# Wrapper
# ----------------------------------------------------------------------------
def _pick_samples_per_block(N, C_in, C_out, L_out, cdtype, out_dtype,
                            vmem_budget_bytes=20 * 2 ** 20):
    """Largest Nb that fits the VMEM budget, while keeping >= 2 grid steps."""
    seg = L_out + 4
    item = jnp.dtype(cdtype).itemsize
    oitem = jnp.dtype(out_dtype).itemsize
    k_max = max(6 * C_in, 5 * C_out)
    per_sample = seg * (2 * (2 * C_in) * item      # z block (double-buffered)
                        + 2 * C_out * oitem        # out block (double-buffered)
                        + C_out * item             # persistent activation buffer
                        + k_max * item)            # persistent im2col slab
    nb = max(1, vmem_budget_bytes // max(per_sample, 1))
    if N >= 2:
        nb = min(nb, -(-N // 2))   # >= 2 grid steps -> both v7x TensorCores busy
    return int(max(1, min(nb, N)))


def encoder_block_forward(x_ncl, wd, w1, w2, bn1, bn2, eps=1e-5,
                          samples_per_block=None,
                          compute_dtype=jnp.bfloat16,
                          out_dtype=jnp.float32):
    """x_ncl: (N, C_in, L).  Conv weights in PyTorch layout (C_out, C_in/C_out, 5).

    bn1/bn2 = (gamma, beta, running_mean, running_var).  Stride fixed to 2
    (module default).  Returns (N, C_out, L_out) in PyTorch NCL layout.
    """
    N, C_in, L = x_ncl.shape
    C_out = wd.shape[0]
    assert wd.shape == (C_out, C_in, 5)
    assert w1.shape == (C_out, C_out, 5) and w2.shape == (C_out, C_out, 5)

    L_out = (L - 1) // 2 + 1              # conv1d: k=5, stride=2, pad=2
    seg = L_out + 4                       # per-sample lane segment

    if samples_per_block is None:
        Nb = _pick_samples_per_block(N, C_in, C_out, L_out, compute_dtype, out_dtype)
    else:
        Nb = max(1, min(int(samples_per_block), N))
    S = -(-N // Nb)                       # grid steps
    N_pad = S * Nb

    raw = Nb * seg                        # columns actually carrying segments
    r128 = -(-raw // 128) * 128
    Wout = r128 if (r128 - raw) * 4 <= raw else raw   # lane-dense when cheap (<25% pad)
    W = Wout + 4
    k_max = max(6 * C_in, 5 * C_out)

    # --- input prep: ONE fused XLA pass (cast + pad + even/odd split + gap) --
    rp = 2 * L_out + 2 - L
    xp = jnp.pad(x_ncl.astype(compute_dtype),
                 ((0, N_pad - N), (0, 0), (2, rp)))          # (N_pad, C_in, 2*(L_out+2))
    z = jnp.concatenate([xp[:, :, 0::2], xp[:, :, 1::2]], axis=1)  # (N_pad, 2C_in, L_out+2)
    z = jnp.pad(z, ((0, 0), (0, 0), (2, 0)))                 # segment = [2 zeros][data]
    z = z.reshape(S, Nb, 2 * C_in, seg).transpose(0, 2, 1, 3).reshape(S, 2 * C_in, raw)
    z = jnp.pad(z, ((0, 0), (0, 0), (0, W - raw)))           # (S, 2*C_in, W)

    # --- weights: per-tap (C_out, C) blocks along K; BN scale folded in f32 --
    wd_slab = jnp.concatenate(
        [jnp.moveaxis(wd, 2, 1).reshape(C_out, 5 * C_in),
         jnp.zeros((C_out, C_in), wd.dtype)],                # zero 6th tap block
        axis=1).astype(compute_dtype)                        # (C_out, 6*C_in)

    def bn_affine(p):
        gamma, beta, mean, var = p
        scale = gamma / jnp.sqrt(var + eps)
        return scale, beta - mean * scale

    s1, sh1 = bn_affine(bn1)
    s2, sh2 = bn_affine(bn2)
    w1_slab = (jnp.moveaxis(w1, 2, 1).reshape(C_out, 5 * C_out)
               * s1[:, None]).astype(compute_dtype)          # scale folded (f32 fold)
    w2_slab = (jnp.moveaxis(w2, 2, 1).reshape(C_out, 5 * C_out)
               * s2[:, None]).astype(compute_dtype)
    shifts = jnp.stack([sh1, sh2], axis=1).astype(jnp.float32)   # (C_out, 2)

    # valid-output-column mask (gap/halo columns forced back to exact zero)
    col = jnp.arange(Wout)
    off = col % seg
    mask = (((off >= 2) & (off < 2 + L_out) & (col < raw))
            .astype(jnp.float32)[None, :])                   # (1, Wout)

    # VMEM footprint -> scoped limit (above the 16 MiB v5e default, capped).
    item = jnp.dtype(compute_dtype).itemsize
    oitem = jnp.dtype(out_dtype).itemsize
    est = (2 * (2 * C_in) * W * item + 2 * C_out * Wout * oitem
           + C_out * W * item + k_max * Wout * item
           + 2 * (6 * C_in + 10 * C_out) * C_out * item + 4 * (2 * C_out + Wout))
    vmem_limit = int(min(max(32 * 2 ** 20, 2 * est), 100 * 2 ** 20))

    out = pl.pallas_call(
        _encoder_kernel,
        out_shape=jax.ShapeDtypeStruct((S, C_out, Wout), out_dtype),
        grid_spec=pltpu.PrefetchScalarGridSpec(
            num_scalar_prefetch=0,
            grid=(S,),
            in_specs=[
                pl.BlockSpec((1, 2 * C_in, W), lambda n: (n, 0, 0)),   # z
                pl.BlockSpec((C_out, 6 * C_in), lambda n: (0, 0)),     # wd slab
                pl.BlockSpec((C_out, 5 * C_out), lambda n: (0, 0)),    # w1 slab (*bn1)
                pl.BlockSpec((C_out, 5 * C_out), lambda n: (0, 0)),    # w2 slab (*bn2)
                pl.BlockSpec((C_out, 2), lambda n: (0, 0)),            # packed BN shifts
                pl.BlockSpec((1, Wout), lambda n: (0, 0)),             # valid-column mask
            ],
            out_specs=pl.BlockSpec((1, C_out, Wout), lambda n: (n, 0, 0)),
            scratch_shapes=[pltpu.VMEM((C_out, W), compute_dtype),     # activation buf
                            pltpu.VMEM((k_max, Wout), compute_dtype)], # im2col slab
        ),
        compiler_params=pltpu.CompilerParams(
            dimension_semantics=("parallel",),
            vmem_limit_bytes=vmem_limit),
    )(z, wd_slab, w1_slab, w2_slab, shifts, mask)

    # --- un-gap: (S, C_out, Wout) -> (N, C_out, L_out) NCL (cheap plumbing) --
    out = out[:, :, :raw].reshape(S, C_out, Nb, seg)[:, :, :, 2:2 + L_out]
    out = out.transpose(0, 2, 1, 3).reshape(N_pad, C_out, L_out)
    return out[:N]


# ---------------- pure-JAX reference (for correctness check) -----------------
def _conv1d_ref(x, w, stride, pad):
    return jax.lax.conv_general_dilated(
        x, w, window_strides=(stride,), padding=[(pad, pad)],
        dimension_numbers=("NCH", "OIH", "NCH"))


def _reference_forward(x, wd, w1, w2, bn1, bn2, eps=1e-5):
    def bn(y, p):
        gamma, beta, mean, var = p
        scale = (gamma / jnp.sqrt(var + eps)).reshape(1, -1, 1)
        shift = (beta - mean * gamma / jnp.sqrt(var + eps)).reshape(1, -1, 1)
        return y * scale + shift

    out = _conv1d_ref(x, wd, stride=2, pad=2)
    out = _conv1d_ref(out, w1, stride=1, pad=2)
    out = jnp.maximum(bn(out, bn1), 0.0)
    out = _conv1d_ref(out, w2, stride=1, pad=2)
    out = jnp.maximum(bn(out, bn2), 0.0)
    return out


if __name__ == "__main__":
    key = jax.random.PRNGKey(0)
    keys = jax.random.split(key, 8)

    N, C_in, C_out, L = 4, 4, 8, 32
    x = jax.random.normal(keys[0], (N, C_in, L), dtype=jnp.float32)
    wd = 0.1 * jax.random.normal(keys[1], (C_out, C_in, 5), dtype=jnp.float32)
    w1 = 0.1 * jax.random.normal(keys[2], (C_out, C_out, 5), dtype=jnp.float32)
    w2 = 0.1 * jax.random.normal(keys[3], (C_out, C_out, 5), dtype=jnp.float32)

    def make_bn(k):
        ka, kb, kc, kd = jax.random.split(k, 4)
        gamma = 1.0 + 0.1 * jax.random.normal(ka, (C_out,), dtype=jnp.float32)
        beta = 0.1 * jax.random.normal(kb, (C_out,), dtype=jnp.float32)
        mean = 0.05 * jax.random.normal(kc, (C_out,), dtype=jnp.float32)
        var = 0.5 + 0.3 * jnp.abs(jax.random.normal(kd, (C_out,), dtype=jnp.float32))
        return (gamma, beta, mean, var)

    bn1 = make_bn(keys[4])
    bn2 = make_bn(keys[5])

    ref = jax.block_until_ready(_reference_forward(x, wd, w1, w2, bn1, bn2))

    # f32 compute path: tight semantic check against the XLA reference.
    out_f32 = encoder_block_forward(x, wd, w1, w2, bn1, bn2,
                                    samples_per_block=2,
                                    compute_dtype=jnp.float32)
    out_f32 = jax.block_until_ready(out_f32)
    assert out_f32.shape == ref.shape, (out_f32.shape, ref.shape)
    err32 = float(jnp.max(jnp.abs(out_f32 - ref)))
    assert err32 < 1e-3, err32

    # bf16 fast path (bf16 activations / BN-folded weights, f32 acc + epilogue).
    out_bf16 = encoder_block_forward(x, wd, w1, w2, bn1, bn2,
                                     compute_dtype=jnp.bfloat16)
    out_bf16 = jax.block_until_ready(out_bf16)
    assert out_bf16.shape == ref.shape, (out_bf16.shape, ref.shape)
    errbf = float(jnp.max(jnp.abs(out_bf16 - ref)))
    assert errbf < 3e-2, errbf

    # Odd length + batch not divisible by Nb (exercises padding paths).
    N2, L2 = 3, 31
    x2 = jax.random.normal(keys[6], (N2, C_in, L2), dtype=jnp.float32)
    ref2 = jax.block_until_ready(_reference_forward(x2, wd, w1, w2, bn1, bn2))
    out2 = jax.block_until_ready(
        encoder_block_forward(x2, wd, w1, w2, bn1, bn2,
                              compute_dtype=jnp.float32))
    assert out2.shape == ref2.shape, (out2.shape, ref2.shape)
    err2 = float(jnp.max(jnp.abs(out2 - ref2)))
    assert err2 < 1e-3, err2

    print("KERNEL_OK")
</pallas_src>

<mosaic_0001>
module attributes {stable_mosaic.version = 11 : i64} {
  func.func @_encoder_kernel(%arg0: i32, %arg1: memref<1x8x44xf32, #tpu.memory_space<vmem>>, %arg2: memref<8x24xf32, #tpu.memory_space<vmem>>, %arg3: memref<8x40xf32, #tpu.memory_space<vmem>>, %arg4: memref<8x40xf32, #tpu.memory_space<vmem>>, %arg5: memref<8x2xf32, #tpu.memory_space<vmem>>, %arg6: memref<1x40xf32, #tpu.memory_space<vmem>>, %arg7: memref<1x8x40xf32, #tpu.memory_space<vmem>>, %arg8: memref<8x44xf32, #tpu.memory_space<vmem>>, %arg9: memref<40x40xf32, #tpu.memory_space<vmem>>) attributes {dimension_semantics = [#tpu.dimension_semantics<parallel>], iteration_bounds = array<i64: 2>, scalar_prefetch = 0 : i64, scratch_operands = 2 : i64, tpu.core_type = #tpu.core_type<tc>, window_params = [{transform_indices = @transform_0, window_bounds = array<i64: 1, 8, 44>}, {pipeline_mode = #tpu.pipeline_mode<synchronous>, transform_indices = @transform_1, window_bounds = array<i64: 8, 24>}, {pipeline_mode = #tpu.pipeline_mode<synchronous>, transform_indices = @transform_2, window_bounds = array<i64: 8, 40>}, {pipeline_mode = #tpu.pipeline_mode<synchronous>, transform_indices = @transform_3, window_bounds = array<i64: 8, 40>}, {pipeline_mode = #tpu.pipeline_mode<synchronous>, transform_indices = @transform_4, window_bounds = array<i64: 8, 2>}, {pipeline_mode = #tpu.pipeline_mode<synchronous>, transform_indices = @transform_5, window_bounds = array<i64: 1, 40>}, {transform_indices = @transform_6, window_bounds = array<i64: 1, 8, 40>}]} {
    %c0_i32 = arith.constant 0 : i32
    %0 = arith.cmpi eq, %arg0, %c0_i32 : i32
    %1 = arith.extui %0 : i1 to i32
    %c0_i32_0 = arith.constant 0 : i32
    %2 = arith.cmpi ne, %1, %c0_i32_0 : i32
    scf.if %2 {
      %cst_58 = arith.constant 0.000000e+00 : f32
      %67 = vector.broadcast %cst_58 : f32 to vector<8x2xf32>
      %c0_59 = arith.constant 0 : index
      %c0_60 = arith.constant 0 : index
      %68 = vector.load %arg8[%c0_59, %c0_60] : memref<8x44xf32, #tpu.memory_space<vmem>>, vector<8x2xf32>
      tpu.vector_store %arg8[%c0_59, %c0_60], %67 {strides = array<i32>} : memref<8x44xf32, #tpu.memory_space<vmem>>, vector<8x2xf32>,
      %cst_61 = arith.constant 0.000000e+00 : f32
      %69 = vector.broadcast %cst_61 : f32 to vector<8x2xf32>
      %c0_62 = arith.constant 0 : index
      %c42 = arith.constant 42 : index
      %70 = vector.load %arg8[%c0_62, %c42] : memref<8x44xf32, #tpu.memory_space<vmem>>, vector<8x2xf32>
      tpu.vector_store %arg8[%c0_62, %c42], %69 {strides = array<i32>} : memref<8x44xf32, #tpu.memory_space<vmem>>, vector<8x2xf32>,
    } else {
    }
    %c0 = arith.constant 0 : index
    %c0_1 = arith.constant 0 : index
    %3 = vector.load %arg6[%c0, %c0_1] : memref<1x40xf32, #tpu.memory_space<vmem>>, vector<1x40xf32>
    %4 = vector.shape_cast %3 : vector<1x40xf32> to vector<1x40xf32>
    %5 = vector.broadcast %4 : vector<1x40xf32> to vector<8x40xf32>
    %cst = arith.constant 0.000000e+00 : f32
    %6 = vector.broadcast %cst : f32 to vector<8x40xf32>
    %7 = arith.cmpf ogt, %5, %6 : vector<8x40xf32>
    %c0_2 = arith.constant 0 : index
    %c0_3 = arith.constant 0 : index
    %8 = vector.load %arg5[%c0_2, %c0_3] : memref<8x2xf32, #tpu.memory_space<vmem>>, vector<8x2xf32>
    %9 = vector.extract_strided_slice %8 {offsets = [0, 0], sizes = [8, 1], strides = [1, 1]} : vector<8x2xf32> to vector<8x1xf32>
    %10 = vector.extract_strided_slice %8 {offsets = [0, 1], sizes = [8, 1], strides = [1, 1]} : vector<8x2xf32> to vector<8x1xf32>
    %c0_4 = arith.constant 0 : index
    %c0_5 = arith.constant 0 : index
    %c0_6 = arith.constant 0 : index
    %11 = vector.load %arg1[%c0_4, %c0_5, %c0_6] : memref<1x8x44xf32, #tpu.memory_space<vmem>>, vector<1x8x44xf32>
    %12 = vector.shape_cast %11 : vector<1x8x44xf32> to vector<8x44xf32>
    %13 = vector.extract_strided_slice %12 {offsets = [0, 0], sizes = [8, 40], strides = [1, 1]} : vector<8x44xf32> to vector<8x40xf32>
    %c0_7 = arith.constant 0 : index
    %c0_8 = arith.constant 0 : index
    %14 = vector.load %arg9[%c0_7, %c0_8] : memref<40x40xf32, #tpu.memory_space<vmem>>, vector<8x40xf32>
    tpu.vector_store %arg9[%c0_7, %c0_8], %13 {strides = array<i32>} : memref<40x40xf32, #tpu.memory_space<vmem>>, vector<8x40xf32>,
    %15 = vector.extract_strided_slice %12 {offsets = [0, 1], sizes = [8, 40], strides = [1, 1]} : vector<8x44xf32> to vector<8x40xf32>
    %c8 = arith.constant 8 : index
    %c0_9 = arith.constant 0 : index
    %16 = vector.load %arg9[%c8, %c0_9] : memref<40x40xf32, #tpu.memory_space<vmem>>, vector<8x40xf32>
    tpu.vector_store %arg9[%c8, %c0_9], %15 {strides = array<i32>} : memref<40x40xf32, #tpu.memory_space<vmem>>, vector<8x40xf32>,
    %17 = vector.extract_strided_slice %12 {offsets = [0, 2], sizes = [8, 40], strides = [1, 1]} : vector<8x44xf32> to vector<8x40xf32>
    %c16 = arith.constant 16 : index
    %c0_10 = arith.constant 0 : index
    %18 = vector.load %arg9[%c16, %c0_10] : memref<40x40xf32, #tpu.memory_space<vmem>>, vector<8x40xf32>
    tpu.vector_store %arg9[%c16, %c0_10], %17 {strides = array<i32>} : memref<40x40xf32, #tpu.memory_space<vmem>>, vector<8x40xf32>,
    %c0_11 = arith.constant 0 : index
    %c0_12 = arith.constant 0 : index
    %19 = vector.load %arg2[%c0_11, %c0_12] : memref<8x24xf32, #tpu.memory_space<vmem>>, vector<8x24xf32>
    %c0_13 = arith.constant 0 : index
    %c0_14 = arith.constant 0 : index
    %20 = vector.load %arg9[%c0_13, %c0_14] : memref<40x40xf32, #tpu.memory_space<vmem>>, vector<24x40xf32>
    %cst_15 = arith.constant dense<0.000000e+00> : vector<8x40xf32>
    %21 = tpu.matmul %19, %20, %cst_15 {dimension_numbers = #tpu.dot_dimension_numbers<[1], [0], [0], [1], [0, 0, 1, 1], [], []>} : vector<8x24xf32>, vector<24x40xf32>, vector<8x40xf32> -> vector<8x40xf32>
    %cst_16 = arith.constant 0.000000e+00 : f32
    %22 = vector.broadcast %cst_16 : f32 to vector<8x40xf32>
    %23 = arith.select %7, %21, %22 : vector<8x40xi1>, vector<8x40xf32>
    %c0_17 = arith.constant 0 : index
    %c2 = arith.constant 2 : index
    %24 = vector.load %arg8[%c0_17, %c2] : memref<8x44xf32, #tpu.memory_space<vmem>>, vector<8x40xf32>
    tpu.vector_store %arg8[%c0_17, %c2], %23 {strides = array<i32>} : memref<8x44xf32, #tpu.memory_space<vmem>>, vector<8x40xf32>,
    %c0_18 = arith.constant 0 : index
    %c0_19 = arith.constant 0 : index
    %25 = vector.load %arg8[%c0_18, %c0_19] : memref<8x44xf32, #tpu.memory_space<vmem>>, vector<8x44xf32>
    %26 = vector.extract_strided_slice %25 {offsets = [0, 0], sizes = [8, 40], strides = [1, 1]} : vector<8x44xf32> to vector<8x40xf32>
    %c0_20 = arith.constant 0 : index
    %c0_21 = arith.constant 0 : index
    %27 = vector.load %arg9[%c0_20, %c0_21] : memref<40x40xf32, #tpu.memory_space<vmem>>, vector<8x40xf32>
    tpu.vector_store %arg9[%c0_20, %c0_21], %26 {strides = array<i32>} : memref<40x40xf32, #tpu.memory_space<vmem>>, vector<8x40xf32>,
    %28 = vector.extract_strided_slice %25 {offsets = [0, 1], sizes = [8, 40], strides = [1, 1]} : vector<8x44xf32> to vector<8x40xf32>
    %c8_22 = arith.constant 8 : index
    %c0_23 = arith.constant 0 : index
    %29 = vector.load %arg9[%c8_22, %c0_23] : memref<40x40xf32, #tpu.memory_space<vmem>>, vector<8x40xf32>
    tpu.vector_store %arg9[%c8_22, %c0_23], %28 {strides = array<i32>} : memref<40x40xf32, #tpu.memory_space<vmem>>, vector<8x40xf32>,
    %30 = vector.extract_strided_slice %25 {offsets = [0, 2], sizes = [8, 40], strides = [1, 1]} : vector<8x44xf32> to vector<8x40xf32>
    %c16_24 = arith.constant 16 : index
    %c0_25 = arith.constant 0 : index
    %31 = vector.load %arg9[%c16_24, %c0_25] : memref<40x40xf32, #tpu.memory_space<vmem>>, vector<8x40xf32>
    tpu.vector_store %arg9[%c16_24, %c0_25], %30 {strides = array<i32>} : memref<40x40xf32, #tpu.memory_space<vmem>>, vector<8x40xf32>,
    %32 = vector.extract_strided_slice %25 {offsets = [0, 3], sizes = [8, 40], strides = [1, 1]} : vector<8x44xf32> to vector<8x40xf32>
    %c24 = arith.constant 24 : index
    %c0_26 = arith.constant 0 : index
    %33 = vector.load %arg9[%c24, %c0_26] : memref<40x40xf32, #tpu.memory_space<vmem>>, vector<8x40xf32>
    tpu.vector_store %arg9[%c24, %c0_26], %32 {strides = array<i32>} : memref<40x40xf32, #tpu.memory_space<vmem>>, vector<8x40xf32>,
    %34 = vector.extract_strided_slice %25 {offsets = [0, 4], sizes = [8, 40], strides = [1, 1]} : vector<8x44xf32> to vector<8x40xf32>
    %c32 = arith.constant 32 : index
    %c0_27 = arith.constant 0 : index
    %35 = vector.load %arg9[%c32, %c0_27] : memref<40x40xf32, #tpu.memory_space<vmem>>, vector<8x40xf32>
    tpu.vector_store %arg9[%c32, %c0_27], %34 {strides = array<i32>} : memref<40x40xf32, #tpu.memory_space<vmem>>, vector<8x40xf32>,
    %c0_28 = arith.constant 0 : index
    %c0_29 = arith.constant 0 : index
    %36 = vector.load %arg3[%c0_28, %c0_29] : memref<8x40xf32, #tpu.memory_space<vmem>>, vector<8x40xf32>
    %c0_30 = arith.constant 0 : index
    %c0_31 = arith.constant 0 : index
    %37 = vector.load %arg9[%c0_30, %c0_31] : memref<40x40xf32, #tpu.memory_space<vmem>>, vector<40x40xf32>
    %cst_32 = arith.constant dense<0.000000e+00> : vector<8x40xf32>
    %38 = tpu.matmul %36, %37, %cst_32 {dimension_numbers = #tpu.dot_dimension_numbers<[1], [0], [0], [1], [0, 0, 1, 1], [], []>} : vector<8x40xf32>, vector<40x40xf32>, vector<8x40xf32> -> vector<8x40xf32>
    %39 = vector.broadcast %9 : vector<8x1xf32> to vector<8x40xf32>
    %40 = arith.addf %38, %39 : vector<8x40xf32>
    %cst_33 = arith.constant 0.000000e+00 : f32
    %41 = vector.broadcast %cst_33 : f32 to vector<8x40xf32>
    %42 = arith.maximumf %40, %41 : vector<8x40xf32>
    %cst_34 = arith.constant 0.000000e+00 : f32
    %43 = vector.broadcast %cst_34 : f32 to vector<8x40xf32>
    %44 = arith.select %7, %42, %43 : vector<8x40xi1>, vector<8x40xf32>
    %c0_35 = arith.constant 0 : index
    %c2_36 = arith.constant 2 : index
    %45 = vector.load %arg8[%c0_35, %c2_36] : memref<8x44xf32, #tpu.memory_space<vmem>>, vector<8x40xf32>
    tpu.vector_store %arg8[%c0_35, %c2_36], %44 {strides = array<i32>} : memref<8x44xf32, #tpu.memory_space<vmem>>, vector<8x40xf32>,
    %c0_37 = arith.constant 0 : index
    %c0_38 = arith.constant 0 : index
    %46 = vector.load %arg8[%c0_37, %c0_38] : memref<8x44xf32, #tpu.memory_space<vmem>>, vector<8x44xf32>
    %47 = vector.extract_strided_slice %46 {offsets = [0, 0], sizes = [8, 40], strides = [1, 1]} : vector<8x44xf32> to vector<8x40xf32>
    %c0_39 = arith.constant 0 : index
    %c0_40 = arith.constant 0 : index
    %48 = vector.load %arg9[%c0_39, %c0_40] : memref<40x40xf32, #tpu.memory_space<vmem>>, vector<8x40xf32>
    tpu.vector_store %arg9[%c0_39, %c0_40], %47 {strides = array<i32>} : memref<40x40xf32, #tpu.memory_space<vmem>>, vector<8x40xf32>,
    %49 = vector.extract_strided_slice %46 {offsets = [0, 1], sizes = [8, 40], strides = [1, 1]} : vector<8x44xf32> to vector<8x40xf32>
    %c8_41 = arith.constant 8 : index
    %c0_42 = arith.constant 0 : index
    %50 = vector.load %arg9[%c8_41, %c0_42] : memref<40x40xf32, #tpu.memory_space<vmem>>, vector<8x40xf32>
    tpu.vector_store %arg9[%c8_41, %c0_42], %49 {strides = array<i32>} : memref<40x40xf32, #tpu.memory_space<vmem>>, vector<8x40xf32>,
    %51 = vector.extract_strided_slice %46 {offsets = [0, 2], sizes = [8, 40], strides = [1, 1]} : vector<8x44xf32> to vector<8x40xf32>
    %c16_43 = arith.constant 16 : index
    %c0_44 = arith.constant 0 : index
    %52 = vector.load %arg9[%c16_43, %c0_44] : memref<40x40xf32, #tpu.memory_space<vmem>>, vector<8x40xf32>
    tpu.vector_store %arg9[%c16_43, %c0_44], %51 {strides = array<i32>} : memref<40x40xf32, #tpu.memory_space<vmem>>, vector<8x40xf32>,
    %53 = vector.extract_strided_slice %46 {offsets = [0, 3], sizes = [8, 40], strides = [1, 1]} : vector<8x44xf32> to vector<8x40xf32>
    %c24_45 = arith.constant 24 : index
    %c0_46 = arith.constant 0 : index
    %54 = vector.load %arg9[%c24_45, %c0_46] : memref<40x40xf32, #tpu.memory_space<vmem>>, vector<8x40xf32>
    tpu.vector_store %arg9[%c24_45, %c0_46], %53 {strides = array<i32>} : memref<40x40xf32, #tpu.memory_space<vmem>>, vector<8x40xf32>,
    %55 = vector.extract_strided_slice %46 {offsets = [0, 4], sizes = [8, 40], strides = [1, 1]} : vector<8x44xf32> to vector<8x40xf32>
    %c32_47 = arith.constant 32 : index
    %c0_48 = arith.constant 0 : index
    %56 = vector.load %arg9[%c32_47, %c0_48] : memref<40x40xf32, #tpu.memory_space<vmem>>, vector<8x40xf32>
    tpu.vector_store %arg9[%c32_47, %c0_48], %55 {strides = array<i32>} : memref<40x40xf32, #tpu.memory_space<vmem>>, vector<8x40xf32>,
    %c0_49 = arith.constant 0 : index
    %c0_50 = arith.constant 0 : index
    %57 = vector.load %arg4[%c0_49, %c0_50] : memref<8x40xf32, #tpu.memory_space<vmem>>, vector<8x40xf32>
    %c0_51 = arith.constant 0 : index
    %c0_52 = arith.constant 0 : index
    %58 = vector.load %arg9[%c0_51, %c0_52] : memref<40x40xf32, #tpu.memory_space<vmem>>, vector<40x40xf32>
    %cst_53 = arith.constant dense<0.000000e+00> : vector<8x40xf32>
    %59 = tpu.matmul %57, %58, %cst_53 {dimension_numbers = #tpu.dot_dimension_numbers<[1], [0], [0], [1], [0, 0, 1, 1], [], []>} : vector<8x40xf32>, vector<40x40xf32>, vector<8x40xf32> -> vector<8x40xf32>
    %60 = vector.broadcast %10 : vector<8x1xf32> to vector<8x40xf32>
    %61 = arith.addf %59, %60 : vector<8x40xf32>
    %cst_54 = arith.constant 0.000000e+00 : f32
    %62 = vector.broadcast %cst_54 : f32 to vector<8x40xf32>
    %63 = arith.maximumf %61, %62 : vector<8x40xf32>
    %c0_55 = arith.constant 0 : index
    %c0_56 = arith.constant 0 : index
    %c0_57 = arith.constant 0 : index
    %64 = vector.load %arg7[%c0_55, %c0_56, %c0_57] : memref<1x8x40xf32, #tpu.memory_space<vmem>>, vector<1x8x40xf32>
    %65 = vector.shape_cast %64 : vector<1x8x40xf32> to vector<8x40xf32>
    %66 = vector.shape_cast %63 : vector<8x40xf32> to vector<1x8x40xf32>
    tpu.vector_store %arg7[%c0_55, %c0_56, %c0_57], %66 {strides = array<i32>} : memref<1x8x40xf32, #tpu.memory_space<vmem>>, vector<1x8x40xf32>,
    return
  }
  func.func @transform_0(%arg0: i32) -> (i32, i32, i32) {
    %c0_i32 = arith.constant 0 : i32
    %c0_i32_0 = arith.constant 0 : i32
    %c0_i32_1 = arith.constant 0 : i32
    return %arg0, %c0_i32, %c0_i32_0 : i32, i32, i32
  }
  func.func @transform_1(%arg0: i32) -> (i32, i32) {
    %c0_i32 = arith.constant 0 : i32
    %c0_i32_0 = arith.constant 0 : i32
    %c0_i32_1 = arith.constant 0 : i32
    return %c0_i32, %c0_i32_0 : i32, i32
  }
  func.func @transform_2(%arg0: i32) -> (i32, i32) {
    %c0_i32 = arith.constant 0 : i32
    %c0_i32_0 = arith.constant 0 : i32
    %c0_i32_1 = arith.constant 0 : i32
    return %c0_i32, %c0_i32_0 : i32, i32
  }
  func.func @transform_3(%arg0: i32) -> (i32, i32) {
    %c0_i32 = arith.constant 0 : i32
    %c0_i32_0 = arith.constant 0 : i32
    %c0_i32_1 = arith.constant 0 : i32
    return %c0_i32, %c0_i32_0 : i32, i32
  }
  func.func @transform_4(%arg0: i32) -> (i32, i32) {
    %c0_i32 = arith.constant 0 : i32
    %c0_i32_0 = arith.constant 0 : i32
    %c0_i32_1 = arith.constant 0 : i32
    return %c0_i32, %c0_i32_0 : i32, i32
  }
  func.func @transform_5(%arg0: i32) -> (i32, i32) {
    %c0_i32 = arith.constant 0 : i32
    %c0_i32_0 = arith.constant 0 : i32
    %c0_i32_1 = arith.constant 0 : i32
    return %c0_i32, %c0_i32_0 : i32, i32
  }
  func.func @transform_6(%arg0: i32) -> (i32, i32, i32) {
    %c0_i32 = arith.constant 0 : i32
    %c0_i32_0 = arith.constant 0 : i32
    %c0_i32_1 = arith.constant 0 : i32
    return %arg0, %c0_i32, %c0_i32_0 : i32, i32, i32
  }
}

</mosaic_0001>

<bundles_post_ra>
// kernel: tpu_custom_call.1
= control target key start
LH: loop header
LB: loop body
LE: loop exit
PB: predicated region body
PF: predicated region fallthrough
CT: control target
= control target key end

     0   :  { %11 = vsyncpa [#allocation5], 0  ;;  %s1303_s0 = inlined_call_operand.hbm [shape: f32[2,8,44], index: 0, kind: input, shape index: {}]   ;;  %s1304_s1 = inlined_call_operand.vmem [shape: f32[8,24], index: 1, kind: input, shape index: {}]   ;;  %s1305_s2 = inlined_call_operand.vmem [shape: f32[8,40], index: 2, kind: input, shape index: {}]   ;;  %s1306_s3 = inlined_call_operand.hbm [shape: f32[8,40], index: 3, kind: input, shape index: {}]   ;;  %s1307_s4 = inlined_call_operand.vmem [shape: f32[8,2], index: 4, kind: input, shape index: {}]   ;;  %s1308_s5 = inlined_call_operand.vmem [shape: f32[1,40], index: 5, kind: input, shape index: {}]   ;;  %s1309_s6 = inlined_call_operand.hbm [shape: f32[2,8,40], index: 6, kind: output, shape index: {}]  }
   0x1   :  { %13 = vsyncpa [#allocation5 + $0x1], 0 }
   0x2   :  { %14 = vsyncpa [#allocation8], 0 }
   0x3   :  { %15 = vsyncpa [#allocation6], 0 }
   0x4   :  { %17 = vsyncpa [#allocation6 + $0x1], 0  ;;  %s1037_s21 = smov 0   ;;  %s1039_s22 = smov 0  }
   0x5   :  { %s1041_s23 = smov 0   ;;  %s1043_s24 = smov 0  }
   0x6 LB: > { %s1058_s25 = sadd.s32 4294967295, %s986_s24   ;;  %s702_s26 = sadd.s32 4294967294, %s986_s24   ;;  %s986_s24 = sphi %s1043_s24, %s1334_s24   ;;  %s982_s23 = sphi %s1041_s23, %s1333_s23   ;;  %s978_s22 = sphi %s1039_s22, %s1332_s22   ;;  %s974_s21 = sphi %s1037_s21, %s1331_s21  }
   0x7   : > { %p43_p0 = scmp.ne.s32.totalorder %s978_s22, %s974_s21  ;;  %p1310_p1 = scmp.eq.s32.totalorder %s1058_s25, 0 }
   0x8   : > { %p178_p3 = scmp.eq.s32.totalorder %s702_s26, 1  ;;  %p703_p5 = scmp.ge.s32.totalorder %s986_s24, 1 }
   0x9   : > { %p1067_p4 = por %p1310_p1, %p43_p0  ;;  %p185_p7 = scmp.lt.s32.totalorder %s986_s24, 3 }
   0xa   : > { %p1072_p6 = por %p178_p3, %p43_p0  ;;  %s988_s30 = smov [#allocation7]  }
   0xb   : > { %s1313_s27 = scalar_select %p1067_p4, 1, 0 }
   0xc   : > { %s1314_s28 = scalar_select %p1072_p6, 1, 0 }
   0xd   : > { %p1078_p9 = pnand %p703_p5, %p185_p7  ;;  %s204_s7 = sshll.u32 %s988_s30, 4  ;;  %s205_s7 = int_to_ptr.vmem [resolvable:$true] %s204_s7 }
   0xe   : > { %s1086_s8 = sadd.s32 1, %s986_s24   ;;  %s30_s12 = sadd.s32 1, %s982_s23 }
   0xf   : > { %s1315_s29 = scalar_select %p1078_p9, 1, 0 }
  0x10   : > { %p795_p11 = pneg %p1078_p9  ;;  %s27_s10 = ssub.s32 %s986_s24, %s1086_s8 }
  0x11   : > { %p1096_p13 = scmp.eq.s32.totalorder %s27_s10, 0  ;;  %s858_s15 = scalar_lea.hbm %s1306_s3, 128 }
  0x12   : > { %p1090_p12 = pnand %p795_p11, %p1310_p1  ;;  %p859_p3 = scmp.ne.s32.totalorder %s1306_s3, %s858_s15 }
  0x13   : > { %s1317_s11 = scalar_select %p1096_p13, 1, 0 }
  0x14   : > { %p860_p5 = pneg %p1090_p12  ;;  %p865_p10 = scmp.lt.u32.totalorder %s858_s15, %s1306_s3 }
  0x16   : > { %p861_p7 = pnand %p860_p5, %p859_p3 }
  0x18   : > { %p862_p11 = pneg %p861_p7 }
  0x1a   : > { %p867_p8 = pnand %p865_p10, %p862_p11 }
  0x1c   : > { %870 = shalt.err (!%p867_p8)
}
  0x1d   : > { %s871_s20 = scalar_lea.vmem %s205_s7, 128  ;;  %p879_p6 = scmp.lt.s32.totalorder %s205_s7, %s205_s7 }
  0x1e   : > { %p872_p1 = scmp.ne.s32.totalorder %s205_s7, %s871_s20  ;;  %p880_p4 = scmp.lt.s32.totalorder %s871_s20, %s871_s20 }
  0x20   : > { %p874_p2 = pnand %p872_p1, %p860_p5  ;;  %p881_p9 = por %p880_p4, %p879_p6 }
  0x22   : > { %p875_p0 = pneg %p874_p2 }
  0x24   : > { %p882_p13 = pnand %p881_p9, %p875_p0 }
  0x26   : > { %885 = shalt.err (!%p882_p13)
}
  0x27   : > { %798 = dma.hbm_to_vmem [thread:$0]  (!%p1090_p12), %s1306_s3, 128, %s205_s7, [#allocation8]  }
  0x28   : > { %p1318_p1 = scmp.ne.s32.totalorder %s1317_s11, 0  ;;  %p38_p2 = scmp.eq.s32.totalorder %s986_s24, 0 }
  0x29   : > { %p1319_p4 = scmp.ne.s32.totalorder %s982_s23, %s978_s22  ;;  %p1320_p6 = scmp.eq.s32.totalorder %s1058_s25, 1 }
  0x2a   : > { %s1122_s10 = scalar_select %p1318_p1, %s982_s23, %s30_s12  }
  0x2b   : > { %p1130_p8 = por %p1320_p6, %p1319_p4  ;;  %p808_p9 = scmp.lt.s32.totalorder %s986_s24, 2 }
  0x2c   : > { %s221_s13 = sand.u32 1, %s982_s23   ;;  %p1322_p10 = pmov %p1319_p4 }
  0x2d   : > { %s706_s14 = sshll.u32 %s221_s13, 3  ;;  %s707_s15 = sshll.u32 %s986_s24, 7 }
  0x2e   : > { %p39_p13 = por %p38_p2, %p1322_p10  ;;  %s1143_s7 = scalar_lea.hbm %s1303_s0, %s707_s15 }
  0x2f   : > { %s225_s11 = scalar_lea.vmem [#allocation4], %s706_s14  ;;  %s222_s19 = scalar_lea.sflag [#allocation5], %s221_s13 }
  0x30   : > { %s232_s12 = sshll.u32 %s225_s11, 4  ;;  %p1145_p12 = pnand %p808_p9, %p39_p13  ;;  %s1149_s12 = int_to_ptr.vmem [resolvable:$true] %s232_s12 }
  0x31   : > { %s886_s20 = scalar_lea.hbm %s1143_s7, 128  ;;  %s891_s14 = scalar_lea.hbm %s1303_s0, 256 }
  0x32   : > { %p887_p0 = scmp.ne.s32.totalorder %s1143_s7, %s886_s20  ;;  %p888_p3 = pneg %p1145_p12 }
  0x33   : > { %p892_p11 = scmp.lt.u32.totalorder %s1143_s7, %s1303_s0  ;;  %p893_p1 = scmp.lt.u32.totalorder %s891_s14, %s886_s20 }
  0x34   : > { %p889_p5 = pnand %p888_p3, %p887_p0  ;;  %p895_p4 = scmp.lt.u32.totalorder %s886_s20, %s1143_s7 }
  0x35   : > { %p894_p2 = por %p893_p1, %p892_p11 }
  0x36   : > { %p890_p7 = pneg %p889_p5 }
  0x37   : > { %p896_p6 = por %p895_p4, %p894_p2 }
  0x39   : > { %p897_p9 = pnand %p896_p6, %p890_p7 }
  0x3b   : > { %900 = shalt.err (!%p897_p9)
}
  0x3c   : > { %s901_s13 = scalar_lea.vmem %s1149_s12, 128  ;;  %s989_s17 = smov [#allocation4]  }
  0x3d   : > { %p902_p10 = scmp.ne.s32.totalorder %s1149_s12, %s901_s13  ;;  %s906_s11 = sshll.u32 %s989_s17, 4  ;;  %s907_s11 = int_to_ptr.vmem [resolvable:$false] %s906_s11 }
  0x3e   : > { %s908_s26 = scalar_lea.vmem %s907_s11, 256  ;;  %p909_p5 = scmp.lt.s32.totalorder %s1149_s12, %s907_s11 }
  0x3f   : > { %p904_p13 = pnand %p902_p10, %p888_p3  ;;  %p910_p11 = scmp.lt.s32.totalorder %s908_s26, %s901_s13 }
  0x41   : > { %p905_p0 = pneg %p904_p13  ;;  %p911_p1 = por %p910_p11, %p909_p5 }
  0x43   : > { %p912_p2 = pnand %p911_p1, %p905_p0 }
  0x45   : > { %915 = shalt.err (!%p912_p2)
}
  0x46   : > { %802 = dma.hbm_to_vmem [thread:$0]  (!%p1145_p12), %s1143_s7, 128, %s1149_s12, %s222_s19  }
  0x47   : > { %p1324_p7 = scmp.ne.s32.totalorder %s1315_s29, 0 }
  0x48   : > { %s1179_s20 = sand.u32 (!%p1324_p7), 1, %s978_s22   ;;  %p1325_p3 = scmp.ne.s32.totalorder (!%p1324_p7), %s1313_s27, 0 }
  0x49   : > { %241 = sbr.rel (%p1324_p7) target bundleno = 1398 (0x576), region = 44  ;;  %s709_s30 = sshll.u32 (!%p1324_p7), %s1179_s20, 3 }
  0x4a   : > { %s244_s14 = scalar_lea.sflag (!%p1324_p7), [#allocation5], %s1179_s20  ;;  %s247_s15 = scalar_lea.vmem (!%p1324_p7), [#allocation4], %s709_s30 }
  0x50   : > { %961 = dma.done.wait (%p1325_p3), %s244_s14, 128  }
  0x51   : > { %963 = vsyncadd (%p1325_p3), %s244_s14, 4294967168  ;;  %p1326_p4 = scmp.eq.s32.totalorder %s1058_s25, 0 }
  0x53   : > { %965 = dma.done.wait (%p1326_p4), [#allocation8], 128   ;;  %p1327_p12 = pmov %p1326_p4 }
  0x54   : > { %s1191_s29 = scalar_lea.vmem [#allocation9], %s709_s30  ;;  %p1328_p6 = scmp.ne.s32.totalorder %s1058_s25, 0 }
  0x55   : > { %967 = vsyncadd (%p1327_p12), [#allocation8], 4294967168  ;;  %vm284_vm0 = vcmask (!%p1328_p6), 15360   ;;  %vm286_vm1 = vcmask (!%p1328_p6), 359760   ;;  %v990_v0 = vmov (!%p1328_p6), 0.0  }
  0x56   : > { %283 = sbr.rel (%p1328_p6) target bundleno = 93 (0x5d), region = 56  ;;  %285 = vst.msk [vmem:[#allocation2] sm:$0xff] (!%p1328_p6), %vm284_vm0, %v990_v0 }
  0x57   : > { %287 = vst.msk [vmem:[#allocation2] sm:$0xff] (!%p1328_p6), %vm286_vm1, %v990_v0 }
  0x5d PF: > { %v297_v1 = vld [vmem:[%s247_s15] sm:$0xff]  ;;  %vm298_vm2 = vcmask 326656   ;;  %s991_s27 = smov 127   ;;  %v992_v2 = vmov 0.0|0.0   ;;  %vm993_vm3 = vmmov 0   ;;  %v994_v3 = vmov 0.0  }
  0x5e   : > { %301 = vrot.lane.b32.xlu0 %v297_v1, %s991_s27  ;;  %299 = vst.msk [vmem:[#allocation3] sm:$0xff] %vm298_vm2, %v297_v1  ;;  %772 = vmatprep.subr.bf16.mxu0 %v992_v2  ;;  %s995_s7 = smov 126   ;;  %v309_v10 = vld [vmem:[%s1304_s1] sm:$0xff]  ;;  %vm313_vm4 = vcmask 195584   ;;  %s996_s13 = smov 2   ;;  %vm392_vm6 = vcmask 343056  }
  0x5f   : > { %743 = vmatprep.mubr.msk.f32.mxu0 %vm993_vm3, %v994_v3  ;;  %775 = vmatprep.subr.bf16.mxu1 %v992_v2  ;;  %v713_v11 = vld [vmem:[%s1308_s5] ss:$0 sm:$0xff]  ;;  %s997_s17 = smov 124   ;;  %s998_s11 = smov 125   ;;  %v999_v18 = vmov 0   ;;  %v1000_v39 = vmov 1  }
  0x60   : > { %756 = vmatprep.mubr.msk.f32.mxu1 %vm993_vm3, %v994_v3  ;;  %vm295_vm5 = vcmp.gt.f32.partialorder %v713_v11, 0.0  ;;  %v296_v17 = vld [vmem:[%s1307_s4] sm:$0xff]  ;;  %855 = vset.pattern.permute.xlu1 %v999_v18  ;;  %s609_s16 = scalar_lea.sflag [#allocation6], %s1179_s20 }
  0x61   : > { %v413_v29 = vld [vmem:[%s1305_s2] sm:$0xff]  ;;  %857 = vset.pattern.permute.xlu0 %v1000_v39 }
  0x62   : > { %305 = vrot.lane.b32.xlu0 %v297_v1, %s995_s7  ;;  %v523_v50 = vld [vmem:[#allocation7] sm:$0xff] }
  0x65   : > { %v310_v6 = vld [vmem:[#allocation3] sm:$0xff] }
  0xd0   : > { %v302_v4 = vpop.permute.xlu0 %301 }
  0xd1   : > { %304 = vst.msk [vmem:[#allocation3 + $0x8] sm:$0xff] %vm298_vm2, %v302_v4 }
  0xd4   : > { %v306_v5 = vpop.permute.xlu0 %305 }
  0xd5   : > { %308 = vst.msk [vmem:[#allocation3 + $0x10] sm:$0xff] %vm298_vm2, %v306_v5 }
  0xd8   : > { %v311_v7 = vld [vmem:[#allocation3 + $0x8] sm:$0xff] }
  0xd9   : > { %v773_v8 = vpack.c.bf16 %v311_v7, %v310_v6 }
  0xdb   : > { %774 = vmatpush3.bf16.msra.mxu0 %v773_v8 }
  0xdc   : > { %741 = vmatprep.subr.mxu0 %v994_v3  ;;  %v312_v9 = vld [vmem:[#allocation3 + $0x10] sm:$0xff] }
  0xdf   : > { %742 = vmatpush3.msra.mxu0 %v312_v9 }
  0xe0   : > { %744 = vmatmul.mubr.msk.f32.vlgmr.msra.gmra.mrb[0].mxu0 %vm313_vm4, %v309_v10  ;;  %781 = vmatprep.subr.bf16.mxu0 %v992_v2 }
  0xe1   : > { %769 = vmatprep.mubr.msk.f32.mxu0 %vm993_vm3, %v994_v3 }
 0x1b3   : > { %v383_v12 = vpop.f32.mrb[0].mxu0 }
 0x1b4   : > { %v745_v13 = vpop.f32.mrb[1].mxu0  ;;  %v387_v14 = vsel %vm295_vm5, %v383_v12, 0.0 }
 0x1b5   : > { %389 = vrot.lane.b32.xlu1 %v387_v14, %s996_s13 }
 0x227   : > { %v390_v15 = vpop.permute.xlu1 %389 }
 0x228   : > { %393 = vst.msk [vmem:[#allocation2] sm:$0xff] %vm392_vm6, %v390_v15 }
 0x22f   : > { %v394_v16 = vld [vmem:[#allocation2] sm:$0xff] }
 0x230   : > { %401 = vrot.lane.b32.xlu0 %v394_v16, %s995_s7  ;;  %395 = vst.msk [vmem:[#allocation3] sm:$0xff] %vm298_vm2, %v394_v16  ;;  %397 = vrot.lane.b32.xlu1 %v394_v16, %s991_s27 }
 0x234   : > { %409 = vrot.lane.b32.xlu0 %v394_v16, %s997_s17  ;;  %405 = vrot.lane.b32.xlu1 %v394_v16, %s998_s11 }
 0x237   : > { %v414_v23 = vld [vmem:[#allocation3] sm:$0xff] }
 0x238   : > { %421 = vperm.xlu1 %855, %v296_v17  }
 0x23c   : > { %856 = vset.pattern.permute.xlu1 %v1000_v39 }
 0x2a2   : > { %v402_v19 = vpop.permute.xlu0 %401  ;;  %v398_v20 = vpop.permute.xlu1 %397 }
 0x2a3   : > { %404 = vst.msk [vmem:[#allocation3 + $0x10] sm:$0xff] %vm298_vm2, %v402_v19  ;;  %400 = vst.msk [vmem:[#allocation3 + $0x8] sm:$0xff] %vm298_vm2, %v398_v20 }
 0x2a6   : > { %v410_v21 = vpop.permute.xlu0 %409  ;;  %v406_v22 = vpop.permute.xlu1 %405 }
 0x2a7   : > { %412 = vst.msk [vmem:[#allocation3 + $0x20] sm:$0xff] %vm298_vm2, %v410_v21  ;;  %408 = vst.msk [vmem:[#allocation3 + $0x18] sm:$0xff] %vm298_vm2, %v406_v22 }
 0x2aa   : > { %v415_v24 = vld [vmem:[#allocation3 + $0x8] sm:$0xff]  ;;  %v416_v26 = vld [vmem:[#allocation3 + $0x10] sm:$0xff] }
 0x2ab   : > { %v776_v25 = vpack.c.bf16 %v415_v24, %v414_v23 }
 0x2ad   : > { %777 = vmatpush3.bf16.msra.mxu1 %v776_v25 }
 0x2ae   : > { %778 = vmatprep.subr.bf16.mxu1 %v992_v2  ;;  %v417_v27 = vld [vmem:[#allocation3 + $0x18] sm:$0xff]  ;;  %v418_v30 = vld [vmem:[#allocation3 + $0x20] sm:$0xff] }
 0x2af   : > { %v779_v28 = vpack.c.bf16 %v417_v27, %v416_v26 }
 0x2b1   : > { %780 = vmatpush3.bf16.msra.mxu1 %v779_v28 }
 0x2b2   : > { %754 = vmatprep.subr.mxu1 %v994_v3 }
 0x2b5   : > { %755 = vmatpush3.msra.mxu1 %v418_v30 }
 0x2b6   : > { %757 = vmatmul.mubr.msk.f32.vlgmr.msra.gmra.mrb[0].mxu1 %vm298_vm2, %v413_v29 }
 0x2b7   : > { %v422_v31 = vpop.permute.xlu1 %421 }
 0x389   : > { %v493_v32 = vpop.f32.mrb[0].mxu1 }
 0x38a   : > { %v494_v33 = vadd.f32 %v493_v32, %v422_v31  ;;  %v758_v34 = vpop.f32.mrb[1].mxu1 }
 0x38c   : > { %v497_v35 = vmax.f32 %v494_v33, 0.0 }
 0x38e   : > { %v498_v36 = vsel %vm295_vm5, %v497_v35, 0.0 }
 0x38f   : > { %500 = vrot.lane.b32.xlu0 %v498_v36, %s996_s13 }
 0x401   : > { %v501_v37 = vpop.permute.xlu0 %500 }
 0x402   : > { %503 = vst.msk [vmem:[#allocation2] sm:$0xff] %vm392_vm6, %v501_v37 }
 0x409   : > { %v504_v38 = vld [vmem:[#allocation2] sm:$0xff] }
 0x40a   : > { %511 = vrot.lane.b32.xlu0 %v504_v38, %s995_s7  ;;  %505 = vst.msk [vmem:[#allocation3] sm:$0xff] %vm298_vm2, %v504_v38  ;;  %507 = vrot.lane.b32.xlu1 %v504_v38, %s991_s27  ;;  %s718_s27 = sshll.u32 %s1058_s25, 7  ;;  %s622_s7 = sshll.u32 %s1191_s29, 4  ;;  %s1259_s7 = int_to_ptr.vmem [resolvable:$true] %s622_s7 }
 0x40b   : > { %s1257_s19 = scalar_lea.hbm %s1309_s6, %s718_s27  ;;  %s916_s13 = scalar_lea.vmem %s1259_s7, 128 }
 0x40c   : > { %p917_p9 = scmp.ne.s32.totalorder %s1259_s7, %s916_s13  ;;  %s1001_s25 = smov [#allocation9]  }
 0x40e   : > { %519 = vrot.lane.b32.xlu0 %v504_v38, %s997_s17  ;;  %515 = vrot.lane.b32.xlu1 %v504_v38, %s998_s11  ;;  %p918_p10 = pnand %p917_p9, %p1130_p8  ;;  %s920_s17 = sshll.u32 %s1001_s25, 4  ;;  %s921_s17 = int_to_ptr.vmem [resolvable:$false] %s920_s17 }
 0x40f   : > { %s922_s11 = scalar_lea.vmem %s921_s17, 256  ;;  %p923_p0 = scmp.lt.s32.totalorder %s1259_s7, %s921_s17 }
 0x410   : > { %p919_p13 = pneg %p918_p10  ;;  %p924_p5 = scmp.lt.s32.totalorder %s922_s11, %s916_s13 }
 0x411   : > { %v524_v44 = vld [vmem:[#allocation3] sm:$0xff] }
 0x412   : > { %530 = vperm.xlu1 %856, %v296_v17   ;;  %p925_p11 = por %p924_p5, %p923_p0 }
 0x414   : > { %p926_p1 = pnand %p925_p11, %p919_p13 }
 0x47c   : > { %v512_v40 = vpop.permute.xlu0 %511  ;;  %v508_v41 = vpop.permute.xlu1 %507 }
 0x47d   : > { %514 = vst.msk [vmem:[#allocation3 + $0x10] sm:$0xff] %vm298_vm2, %v512_v40  ;;  %510 = vst.msk [vmem:[#allocation3 + $0x8] sm:$0xff] %vm298_vm2, %v508_v41 }
 0x480   : > { %v520_v42 = vpop.permute.xlu0 %519  ;;  %v516_v43 = vpop.permute.xlu1 %515 }
 0x481   : > { %522 = vst.msk [vmem:[#allocation3 + $0x20] sm:$0xff] %vm298_vm2, %v520_v42  ;;  %518 = vst.msk [vmem:[#allocation3 + $0x18] sm:$0xff] %vm298_vm2, %v516_v43 }
 0x484   : > { %v525_v45 = vld [vmem:[#allocation3 + $0x8] sm:$0xff]  ;;  %v526_v47 = vld [vmem:[#allocation3 + $0x10] sm:$0xff] }
 0x485   : > { %v782_v46 = vpack.c.bf16 %v525_v45, %v524_v44 }
 0x487   : > { %783 = vmatpush3.bf16.msra.mxu0 %v782_v46 }
 0x488   : > { %784 = vmatprep.subr.bf16.mxu0 %v992_v2  ;;  %v527_v48 = vld [vmem:[#allocation3 + $0x18] sm:$0xff]  ;;  %v528_v51 = vld [vmem:[#allocation3 + $0x20] sm:$0xff] }
 0x489   : > { %v785_v49 = vpack.c.bf16 %v527_v48, %v526_v47 }
 0x48b   : > { %786 = vmatpush3.bf16.msra.mxu0 %v785_v49 }
 0x48c   : > { %767 = vmatprep.subr.mxu0 %v994_v3 }
 0x48f   : > { %768 = vmatpush3.msra.mxu0 %v528_v51 }
 0x490   : > { %770 = vmatmul.mubr.msk.f32.vlgmr.msra.gmra.mrb[2].mxu0 %vm298_vm2, %v523_v50 }
 0x491   : > { %v531_v52 = vpop.permute.xlu1 %530 }
 0x563   : > { %v602_v53 = vpop.f32.mrb[2].mxu0 }
 0x564   : > { %v603_v54 = vadd.f32 %v602_v53, %v531_v52  ;;  %v771_v55 = vpop.f32.mrb[3].mxu0 }
 0x566   : > { %v606_v56 = vmax.f32 %v603_v54, 0.0 }
 0x568   : > { %607 = vst.msk [vmem:[%s1191_s29] sm:$0xff] %vm298_vm2, %v606_v56 }
 0x569   : > { %929 = shalt.err (!%p926_p1)
}
 0x56a   : > { %s930_s20 = scalar_lea.hbm %s1257_s19, 128  ;;  %s934_s30 = scalar_lea.hbm %s1309_s6, 256 }
 0x56b   : > { %p931_p2 = scmp.ne.s32.totalorder %s1257_s19, %s930_s20  ;;  %p935_p4 = scmp.lt.u32.totalorder %s1257_s19, %s1309_s6 }
 0x56c   : > { %p936_p12 = scmp.lt.u32.totalorder %s934_s30, %s930_s20  ;;  %p938_p9 = scmp.lt.u32.totalorder %s930_s20, %s1257_s19 }
 0x56d   : > { %p932_p7 = pnand %p931_p2, %p1130_p8 }
 0x56e   : > { %p937_p6 = por %p936_p12, %p935_p4 }
 0x56f   : > { %p933_p3 = pneg %p932_p7 }
 0x570   : > { %p939_p10 = por %p938_p9, %p937_p6 }
 0x572   : > { %p940_p13 = pnand %p939_p10, %p933_p3 }
 0x574   : > { %943 = shalt.err (!%p940_p13)
}
 0x575   : > { %793 = dma.vmem_to_hbm [thread:$0]  (%p1130_p8), %s1259_s7, 128, %s1257_s19, %s609_s16  }
 0x576 PF: > { %s634_s27 = sand.u32 1, %s974_s21   ;;  %p1329_p0 = scmp.ne.s32.totalorder %s1314_s28, 0 }
 0x577   : > { %p1330_p5 = scmp.ge.s32.totalorder %s986_s24, 2  ;;  %s635_s12 = scalar_lea.sflag [#allocation6], %s634_s27 }
 0x579   : > { %p804_p11 = pnand %p1330_p5, %p1329_p0 }
 0x57b   : > { %969 = dma.done.wait (!%p804_p11), %s635_s12, 128  }
 0x57c   : > { %971 = vsyncadd (!%p804_p11), %s635_s12, 4294967168  ;;  %p20_p1 = scmp.ge.s32.totalorder %s1086_s8, 4   ;;  %s1331_s21 = smov %s978_s22 }
 0x57d   : > { %s1332_s22 = smov %s982_s23  ;;  %s1333_s23 = smov %s1122_s10 }
 0x57e   : > { %s1334_s24 = smov %s1086_s8  ;;  %22 = sbr.rel (!%p20_p1) target bundleno = 6 (0x6), region = 97 }
 0x585   :  { %640 = vsyncpa [#allocation5], 1 }
 0x586   :  { %642 = vsyncpa [#allocation5 + $0x1], 1 }
 0x587   :  { %643 = vsyncpa [#allocation8], 1 }
 0x588   :  { %644 = vsyncpa [#allocation6], 1 }
 0x589   :  { %646 = vsyncpa [#allocation6 + $0x1], 1 }

</bundles_post_ra>
